<compile_context>
chip_gen: v7x
topology: tpu7x:2x2x1
jax: 0.10.0
libtpu: 0.0.40
codegen_flags: <defaults>
</compile_context>

<pallas_src>
import functools

import jax
import jax.numpy as jnp
from jax.experimental import pallas as pl
from jax.experimental.pallas import tpu as pltpu


def _gelu_tanh(x):
    # tanh-based GELU (== jax.nn.gelu approximate=True); tanh runs on the EUP slot.
    # TODO(synk): torch nn.GELU() default is exact erf; tanh approx differs by <~1e-3.
    c = 0.7978845608028654  # sqrt(2/pi)
    return 0.5 * x * (1.0 + jnp.tanh(c * (x + 0.044715 * x * x * x)))


def gate_kernel(block_ref, mask_ref, recip_ref, pivot_ref,
                w1_ref, b1_ref, w2_ref, b2w3_ref, b3_ref,
                out_ref, *, use_bf16_act):
    Bblk, NS, D = block_ref.shape
    N = pivot_ref.shape[1]
    S = NS // N
    H1 = w1_ref.shape[1]
    act_dtype = jnp.bfloat16 if use_bf16_act else jnp.float32

    blk3 = block_ref[...]                           # (Bblk, NS, D)  bf16
    blk2 = blk3.reshape(Bblk * NS, D)               # (rows, D)

    # ---- global feature: masked sum on the MXU, exact f32 scale by precomputed
    #      reciprocal count (normalization hoisted to the wrapper) ----
    g_sum = jnp.einsum('bqk,bkd->bqd', mask_ref[...], blk3,
                       preferred_element_type=jnp.float32)         # (Bblk, 1, D)
    g = g_sum * recip_ref[...]                                      # (Bblk, 1, D) f32

    # ---- layer 1, block path: (Bblk*NS, D) @ (D, H1) ----
    h_blk = jnp.dot(blk2, w1_ref[:D, :],
                    preferred_element_type=jnp.float32)             # (rows, H1)

    # ---- layer 1, fused pivot+global path: (Bblk*N, 2D) @ (2D, H1) ----
    piv = pivot_ref[...]                                            # (Bblk, N, D) bf16
    g_rows = jnp.broadcast_to(g.astype(piv.dtype), (Bblk, N, D))
    pg = jnp.concatenate([piv, g_rows], axis=-1).reshape(Bblk * N, 2 * D)
    h_pg = jnp.dot(pg, w1_ref[D:, :],
                   preferred_element_type=jnp.float32)              # (Bblk*N, H1)

    # pre-combine the small per-chunk terms, then a single broadcast-add over S
    add_term = (h_pg + b1_ref[...]).astype(act_dtype)               # (Bblk*N, H1)
    h1 = (h_blk.astype(act_dtype).reshape(Bblk, N, S, H1)
          + add_term.reshape(Bblk, N, 1, H1))
    h1 = _gelu_tanh(h1).reshape(Bblk * NS, H1)

    # ---- layer 2: Linear(2D -> D) + GELU (accumulate f32) ----
    h2 = jnp.dot(h1.astype(w2_ref.dtype), w2_ref[...],
                 preferred_element_type=jnp.float32) + b2w3_ref[0, :]
    h2 = _gelu_tanh(h2)                                             # (rows, D) f32

    # ---- layer 3: Linear(D -> 1): elementwise mul + lane reduce; logits land in
    #      the lane-dense (1, 1, Bblk*NS) output layout (one wide unmasked store) ----
    red = jnp.sum(h2.reshape(Bblk, NS, D) * b2w3_ref[1, :], axis=-1)  # (Bblk, NS)
    out_ref[...] = (red + b3_ref[0]).reshape(1, 1, Bblk * NS).astype(out_ref.dtype)


def _tpu_generation():
    try:
        kind = jax.devices()[0].device_kind.lower()
    except Exception:
        return "unknown"
    if "v7" in kind:
        return "v7x"
    if "v6" in kind:
        return "v6e"
    if "v5" in kind and ("lite" in kind or "v5e" in kind):
        return "v5e"
    return "unknown"


def _gen_config():
    gen = _tpu_generation()
    if gen == "v7x":
        # 64 MiB VMEM per TC, 2 TCs: modest per-step footprint, >=2 (even) grid
        # steps so dimension_semantics=("parallel",) can shard across cores,
        # bf16-native VPU/EUP -> bf16 activation math.
        return dict(target_rows=512, step_budget=22 << 20, vmem_limit=44 << 20,
                    bf16_act=True, prefer_multi_step=True)
    if gen == "v6e":
        # single TC, 128 MiB physical VMEM: fewer, fatter steps.
        return dict(target_rows=1024, step_budget=48 << 20, vmem_limit=96 << 20,
                    bf16_act=True, prefer_multi_step=False)
    if gen == "v5e":
        # no bf16 VPU/EUP: keep elementwise / GELU math in f32.
        return dict(target_rows=384, step_budget=32 << 20, vmem_limit=64 << 20,
                    bf16_act=False, prefer_multi_step=False)
    # conservative defaults for unknown chips
    return dict(target_rows=512, step_budget=20 << 20, vmem_limit=32 << 20,
                bf16_act=False, prefer_multi_step=True)


def _step_bytes(bblk, NS, N, D, H1, act_bytes):
    """Rough per-grid-step VMEM footprint estimate."""
    rows = bblk * NS
    tiles = 2 * (rows * D * 2          # block tile (bf16, double-buffered)
                 + bblk * NS * 2       # mask tile (bf16)
                 + bblk * 4            # reciprocal counts (f32)
                 + bblk * N * D * 2    # pivot tile (bf16)
                 + rows * 4)           # output tile (f32)
    wts = 2 * (3 * D * H1 * 2 + H1 * 4 + H1 * D * 2 + 2 * D * 4)
    inter = (rows * H1 * 4             # h_blk (f32)
             + rows * H1 * act_bytes   # h1 activations
             + rows * D * 4            # h2 (f32)
             + bblk * N * H1 * 4)      # fused pivot+global term (f32)
    return tiles + wts + inter


def _choose_bblk(B, NS, N, D, H1, *, target_rows, step_budget, act_bytes,
                 prefer_multi_step):
    """Pick batch-elements-per-grid-step (a divisor of B)."""
    divs = [d for d in range(1, B + 1) if B % d == 0]
    fit = [d for d in divs if _step_bytes(d, NS, N, D, H1, act_bytes) <= step_budget]
    if not fit:
        fit = [1]
    if prefer_multi_step and B > 1:
        # keep >= 2 grid steps (v7x megacore); prefer an even grid length
        multi = [d for d in fit if B // d >= 2]
        if multi:
            even = [d for d in multi if (B // d) % 2 == 0]
            fit = even or multi
    for d in fit:                      # smallest step reaching the row target
        if d * NS >= target_rows:
            return d
    return fit[-1]                     # otherwise the fattest fitting step


def internal_gate_forward(block, pivot, block_mask, params):
    """block: (B*N, S, D) f32, pivot: (B, N, D) f32, block_mask: (B*N, S) int.
    Returns (B, N*S) f32, matching InternalGate.forward (eval mode)."""
    w1, b1, w2, b2, w3, b3 = params      # torch Linear layout: (out, in)
    B, N, D = pivot.shape
    S = block.shape[-2]
    NS = N * S
    H1 = 2 * D

    cfg = _gen_config()

    # bf16 matmul operands (f32 accumulation in-kernel)
    block_ = block.reshape(B, NS, D).astype(jnp.bfloat16)
    mask_ = block_mask.reshape(B, 1, NS).astype(jnp.bfloat16)      # 0/1, MXU operand
    # hoisted mask normalization: exact per-batch f32 reciprocal counts
    cnt = jnp.maximum(block_mask.reshape(B, NS).astype(jnp.float32).sum(axis=-1), 1.0)
    recip_ = (1.0 / cnt).reshape(B, 1, 1)
    pivot_ = pivot.astype(jnp.bfloat16)

    # packed weights: W1 as one (3D, H1) array (split in-kernel with static slices
    # matching cat(block_, local, global)); b2/w3 packed into one (2, D) array.
    w1t = w1.T.astype(jnp.bfloat16)                                # (3D, H1)
    w2t = w2.T.astype(jnp.bfloat16)                                # (H1, D)
    b1_ = b1.reshape(1, H1).astype(jnp.float32)
    b2w3 = jnp.stack([b2.astype(jnp.float32),
                      w3.reshape(D).astype(jnp.float32)], axis=0)  # (2, D)
    b3_ = b3.reshape(1).astype(jnp.float32)

    act_bytes = 2 if cfg["bf16_act"] else 4
    Bblk = _choose_bblk(B, NS, N, D, H1,
                        target_rows=cfg["target_rows"],
                        step_budget=cfg["step_budget"],
                        act_bytes=act_bytes,
                        prefer_multi_step=cfg["prefer_multi_step"])
    grid_len = B // Bblk

    kernel = functools.partial(gate_kernel, use_bf16_act=cfg["bf16_act"])

    out = pl.pallas_call(
        kernel,
        out_shape=jax.ShapeDtypeStruct((grid_len, 1, Bblk * NS), jnp.float32),
        grid_spec=pltpu.PrefetchScalarGridSpec(
            num_scalar_prefetch=0,
            grid=(grid_len,),
            in_specs=[
                pl.BlockSpec((Bblk, NS, D), lambda b: (b, 0, 0)),   # block_
                pl.BlockSpec((Bblk, 1, NS), lambda b: (b, 0, 0)),   # mask (lane-dense)
                pl.BlockSpec((Bblk, 1, 1), lambda b: (b, 0, 0)),    # 1/count (f32)
                pl.BlockSpec((Bblk, N, D), lambda b: (b, 0, 0)),    # pivot
                pl.BlockSpec((3 * D, H1), lambda b: (0, 0)),        # W1 (packed, T)
                pl.BlockSpec((1, H1), lambda b: (0, 0)),            # b1
                pl.BlockSpec((H1, D), lambda b: (0, 0)),            # W2 (T)
                pl.BlockSpec((2, D), lambda b: (0, 0)),             # [b2; w3]
                pl.BlockSpec(memory_space=pltpu.MemorySpace.SMEM),  # b3 scalar
            ],
            out_specs=pl.BlockSpec((1, 1, Bblk * NS), lambda b: (b, 0, 0)),
        ),
        compiler_params=pltpu.CompilerParams(
            dimension_semantics=("parallel",),
            vmem_limit_bytes=cfg["vmem_limit"],
        ),
    )(block_, mask_, recip_, pivot_, w1t, b1_, w2t, b2w3, b3_)

    return out.reshape(B, NS)          # (B, N*S)


def reference_forward(block, pivot, block_mask, params):
    """Pure-JAX f32 reference mirroring the torch module (eval mode, exact-erf GELU)."""
    w1, b1, w2, b2, w3, b3 = params
    B, N, D = pivot.shape
    S = block.shape[-2]
    block_ = block.reshape(B, N * S, D).astype(jnp.float32)
    mask_ = block_mask.reshape(B, N * S).astype(jnp.float32)
    local = jnp.broadcast_to(pivot[:, :, None, :], (B, N, S, D)).reshape(B, N * S, D)
    cnt = jnp.maximum(mask_.sum(axis=1, keepdims=True), 1.0)
    g = (block_ * mask_[..., None]).sum(axis=1) / cnt
    g = jnp.broadcast_to(g[:, None, :], block_.shape)
    feat = jnp.concatenate([block_, local, g], axis=-1)
    h1 = jax.nn.gelu(feat @ w1.T + b1, approximate=False)
    h2 = jax.nn.gelu(h1 @ w2.T + b2, approximate=False)
    out = h2 @ w3.T + b3
    return out[..., 0]


def init_params(key, hidden_size):
    D, H1 = hidden_size, 2 * hidden_size
    ks = jax.random.split(key, 6)
    scale = 0.05
    w1 = scale * jax.random.normal(ks[0], (H1, 3 * D), jnp.float32)
    b1 = scale * jax.random.normal(ks[1], (H1,), jnp.float32)
    w2 = scale * jax.random.normal(ks[2], (D, H1), jnp.float32)
    b2 = scale * jax.random.normal(ks[3], (D,), jnp.float32)
    w3 = scale * jax.random.normal(ks[4], (1, D), jnp.float32)
    b3 = scale * jax.random.normal(ks[5], (1,), jnp.float32)
    return (w1, b1, w2, b2, w3, b3)


if __name__ == "__main__":
    B, N, S, D = 2, 4, 8, 32          # batch, chunk_num, chunk_size, hidden_size
    key = jax.random.PRNGKey(0)
    k_blk, k_piv, k_msk, k_par = jax.random.split(key, 4)

    block = jax.random.normal(k_blk, (B * N, S, D), jnp.float32)
    pivot = jax.random.normal(k_piv, (B, N, D), jnp.float32)
    block_mask = (jax.random.uniform(k_msk, (B * N, S)) > 0.3).astype(jnp.int32)
    params = init_params(k_par, D)

    out = internal_gate_forward(block, pivot, block_mask, params)
    out = jax.block_until_ready(out)

    ref = reference_forward(block, pivot, block_mask, params)
    assert out.shape == (B, N * S)
    max_diff = float(jnp.max(jnp.abs(out - ref)))
    # bf16 matmul operands (+ bf16 GELU on v6e/v7x) + tanh-GELU vs f32 exact-erf ref.
    assert jnp.allclose(out, ref, rtol=3e-2, atol=3e-2), f"max abs diff {max_diff}"

    print("KERNEL_OK")
</pallas_src>

<mosaic_0001>
module attributes {stable_mosaic.version = 11 : i64} {
  func.func @gate_kernel(%arg0: i32, %arg1: memref<1x32x32xbf16, #tpu.memory_space<vmem>>, %arg2: memref<1x1x32xbf16, #tpu.memory_space<vmem>>, %arg3: memref<1x1x1xf32, #tpu.memory_space<vmem>>, %arg4: memref<1x4x32xbf16, #tpu.memory_space<vmem>>, %arg5: memref<96x64xbf16, #tpu.memory_space<vmem>>, %arg6: memref<1x64xf32, #tpu.memory_space<vmem>>, %arg7: memref<64x32xbf16, #tpu.memory_space<vmem>>, %arg8: memref<2x32xf32, #tpu.memory_space<vmem>>, %arg9: memref<1xf32, #tpu.memory_space<smem>>, %arg10: memref<1x1x32xf32, #tpu.memory_space<vmem>>) attributes {dimension_semantics = [#tpu.dimension_semantics<parallel>], iteration_bounds = array<i64: 2>, scalar_prefetch = 0 : i64, scratch_operands = 0 : i64, tpu.core_type = #tpu.core_type<tc>, window_params = [{transform_indices = @transform_0, window_bounds = array<i64: 1, 32, 32>}, {transform_indices = @transform_1, window_bounds = array<i64: 1, 1, 32>}, {transform_indices = @transform_2, window_bounds = array<i64: 1, 1, 1>}, {transform_indices = @transform_3, window_bounds = array<i64: 1, 4, 32>}, {pipeline_mode = #tpu.pipeline_mode<synchronous>, transform_indices = @transform_4, window_bounds = array<i64: 96, 64>}, {pipeline_mode = #tpu.pipeline_mode<synchronous>, transform_indices = @transform_5, window_bounds = array<i64: 1, 64>}, {pipeline_mode = #tpu.pipeline_mode<synchronous>, transform_indices = @transform_6, window_bounds = array<i64: 64, 32>}, {pipeline_mode = #tpu.pipeline_mode<synchronous>, transform_indices = @transform_7, window_bounds = array<i64: 2, 32>}, {transform_indices = @transform_8, window_bounds = array<i64: 1>}, {transform_indices = @transform_9, window_bounds = array<i64: 1, 1, 32>}]} {
    %c0 = arith.constant 0 : index
    %c0_0 = arith.constant 0 : index
    %c0_1 = arith.constant 0 : index
    %0 = vector.load %arg1[%c0, %c0_0, %c0_1] : memref<1x32x32xbf16, #tpu.memory_space<vmem>>, vector<1x32x32xbf16>
    %1 = vector.shape_cast %0 : vector<1x32x32xbf16> to vector<32x32xbf16>
    %c0_2 = arith.constant 0 : index
    %c0_3 = arith.constant 0 : index
    %c0_4 = arith.constant 0 : index
    %2 = vector.load %arg2[%c0_2, %c0_3, %c0_4] : memref<1x1x32xbf16, #tpu.memory_space<vmem>>, vector<1x1x32xbf16>
    "tpu.trace_start"() <{level = 10 : i32, message = "bqk,bkd->bqd"}> : () -> ()
    %cst = arith.constant dense<0.000000e+00> : vector<1x1x32xf32>
    %3 = tpu.matmul %2, %0, %cst {dimension_numbers = #tpu.dot_dimension_numbers<[2], [1], [1], [2], [0, 0, 0, 1, 1, 2], [0], [0]>} : vector<1x1x32xbf16>, vector<1x32x32xbf16>, vector<1x1x32xf32> -> vector<1x1x32xf32>
    "tpu.trace_stop"() : () -> ()
    %c0_5 = arith.constant 0 : index
    %c0_6 = arith.constant 0 : index
    %c0_7 = arith.constant 0 : index
    %4 = vector.load %arg3[%c0_5, %c0_6, %c0_7] : memref<1x1x1xf32, #tpu.memory_space<vmem>>, vector<1x1x1xf32>
    %5 = vector.broadcast %4 : vector<1x1x1xf32> to vector<1x1x32xf32>
    %6 = arith.mulf %3, %5 : vector<1x1x32xf32>
    %c0_8 = arith.constant 0 : index
    %c0_9 = arith.constant 0 : index
    %7 = vector.load %arg5[%c0_8, %c0_9] : memref<96x64xbf16, #tpu.memory_space<vmem>>, vector<32x64xbf16>
    %cst_10 = arith.constant dense<0.000000e+00> : vector<32x64xf32>
    %8 = tpu.matmul %1, %7, %cst_10 {dimension_numbers = #tpu.dot_dimension_numbers<[1], [0], [0], [1], [0, 0, 1, 1], [], []>} : vector<32x32xbf16>, vector<32x64xbf16>, vector<32x64xf32> -> vector<32x64xf32>
    %c0_11 = arith.constant 0 : index
    %c0_12 = arith.constant 0 : index
    %c0_13 = arith.constant 0 : index
    %9 = vector.load %arg4[%c0_11, %c0_12, %c0_13] : memref<1x4x32xbf16, #tpu.memory_space<vmem>>, vector<1x4x32xbf16>
    %10 = arith.truncf %6 : vector<1x1x32xf32> to vector<1x1x32xbf16>
    %11 = vector.shape_cast %10 : vector<1x1x32xbf16> to vector<1x1x32xbf16>
    %12 = vector.broadcast %11 : vector<1x1x32xbf16> to vector<1x4x32xbf16>
    %13 = tpu.concatenate %9, %12 in 2 : vector<1x4x32xbf16>, vector<1x4x32xbf16> -> vector<1x4x64xbf16>
    %14 = vector.shape_cast %13 : vector<1x4x64xbf16> to vector<4x64xbf16>
    %c32 = arith.constant 32 : index
    %c0_14 = arith.constant 0 : index
    %15 = vector.load %arg5[%c32, %c0_14] : memref<96x64xbf16, #tpu.memory_space<vmem>>, vector<64x64xbf16>
    %cst_15 = arith.constant dense<0.000000e+00> : vector<4x64xf32>
    %16 = tpu.matmul %14, %15, %cst_15 {dimension_numbers = #tpu.dot_dimension_numbers<[1], [0], [0], [1], [0, 0, 1, 1], [], []>} : vector<4x64xbf16>, vector<64x64xbf16>, vector<4x64xf32> -> vector<4x64xf32>
    %c0_16 = arith.constant 0 : index
    %c0_17 = arith.constant 0 : index
    %17 = vector.load %arg6[%c0_16, %c0_17] : memref<1x64xf32, #tpu.memory_space<vmem>>, vector<1x64xf32>
    %18 = vector.broadcast %17 : vector<1x64xf32> to vector<4x64xf32>
    %19 = arith.addf %16, %18 : vector<4x64xf32>
    %20 = vector.shape_cast %8 : vector<32x64xf32> to vector<1x4x8x64xf32>
    %21 = vector.shape_cast %19 : vector<4x64xf32> to vector<1x4x1x64xf32>
    %22 = vector.broadcast %21 : vector<1x4x1x64xf32> to vector<1x4x8x64xf32>
    %23 = arith.addf %20, %22 : vector<1x4x8x64xf32>
    %cst_18 = arith.constant 5.000000e-01 : f32
    %24 = vector.broadcast %cst_18 : f32 to vector<1x4x8x64xf32>
    %25 = arith.mulf %24, %23 : vector<1x4x8x64xf32>
    %cst_19 = arith.constant 4.471500e-02 : f32
    %26 = vector.broadcast %cst_19 : f32 to vector<1x4x8x64xf32>
    %27 = arith.mulf %26, %23 : vector<1x4x8x64xf32>
    %28 = arith.mulf %27, %23 : vector<1x4x8x64xf32>
    %29 = arith.mulf %28, %23 : vector<1x4x8x64xf32>
    %30 = arith.addf %23, %29 : vector<1x4x8x64xf32>
    %cst_20 = arith.constant 0.797884583 : f32
    %31 = vector.broadcast %cst_20 : f32 to vector<1x4x8x64xf32>
    %32 = arith.mulf %31, %30 : vector<1x4x8x64xf32>
    %33 = math.tanh %32 : vector<1x4x8x64xf32>
    %cst_21 = arith.constant 1.000000e+00 : f32
    %34 = vector.broadcast %cst_21 : f32 to vector<1x4x8x64xf32>
    %35 = arith.addf %34, %33 : vector<1x4x8x64xf32>
    %36 = arith.mulf %25, %35 : vector<1x4x8x64xf32>
    %37 = vector.shape_cast %36 : vector<1x4x8x64xf32> to vector<32x64xf32>
    %38 = arith.truncf %37 : vector<32x64xf32> to vector<32x64xbf16>
    %c0_22 = arith.constant 0 : index
    %c0_23 = arith.constant 0 : index
    %39 = vector.load %arg7[%c0_22, %c0_23] : memref<64x32xbf16, #tpu.memory_space<vmem>>, vector<64x32xbf16>
    %cst_24 = arith.constant dense<0.000000e+00> : vector<32x32xf32>
    %40 = tpu.matmul %38, %39, %cst_24 {dimension_numbers = #tpu.dot_dimension_numbers<[1], [0], [0], [1], [0, 0, 1, 1], [], []>} : vector<32x64xbf16>, vector<64x32xbf16>, vector<32x32xf32> -> vector<32x32xf32>
    %c0_25 = arith.constant 0 : index
    %c0_26 = arith.constant 0 : index
    %41 = vector.load %arg8[%c0_25, %c0_26] : memref<2x32xf32, #tpu.memory_space<vmem>>, vector<1x32xf32>
    %42 = vector.shape_cast %41 : vector<1x32xf32> to vector<32xf32>
    %43 = vector.shape_cast %42 : vector<32xf32> to vector<1x32xf32>
    %44 = vector.broadcast %43 : vector<1x32xf32> to vector<32x32xf32>
    %45 = arith.addf %40, %44 : vector<32x32xf32>
    %cst_27 = arith.constant 5.000000e-01 : f32
    %46 = vector.broadcast %cst_27 : f32 to vector<32x32xf32>
    %47 = arith.mulf %46, %45 : vector<32x32xf32>
    %cst_28 = arith.constant 4.471500e-02 : f32
    %48 = vector.broadcast %cst_28 : f32 to vector<32x32xf32>
    %49 = arith.mulf %48, %45 : vector<32x32xf32>
    %50 = arith.mulf %49, %45 : vector<32x32xf32>
    %51 = arith.mulf %50, %45 : vector<32x32xf32>
    %52 = arith.addf %45, %51 : vector<32x32xf32>
    %cst_29 = arith.constant 0.797884583 : f32
    %53 = vector.broadcast %cst_29 : f32 to vector<32x32xf32>
    %54 = arith.mulf %53, %52 : vector<32x32xf32>
    %55 = math.tanh %54 : vector<32x32xf32>
    %cst_30 = arith.constant 1.000000e+00 : f32
    %56 = vector.broadcast %cst_30 : f32 to vector<32x32xf32>
    %57 = arith.addf %56, %55 : vector<32x32xf32>
    %58 = arith.mulf %47, %57 : vector<32x32xf32>
    %59 = vector.shape_cast %58 : vector<32x32xf32> to vector<1x32x32xf32>
    %c1 = arith.constant 1 : index
    %c0_31 = arith.constant 0 : index
    %60 = vector.load %arg8[%c1, %c0_31] : memref<2x32xf32, #tpu.memory_space<vmem>>, vector<1x32xf32>
    %61 = vector.shape_cast %60 : vector<1x32xf32> to vector<32xf32>
    %62 = vector.shape_cast %61 : vector<32xf32> to vector<1x1x32xf32>
    %63 = vector.broadcast %62 : vector<1x1x32xf32> to vector<1x32x32xf32>
    %64 = arith.mulf %59, %63 : vector<1x32x32xf32>
    %cst_32 = arith.constant dense<0.000000e+00> : vector<1x32xf32>
    %65 = vector.multi_reduction <add>, %64, %cst_32 [2] : vector<1x32x32xf32> to vector<1x32xf32>
    %c0_33 = arith.constant 0 : index
    %66 = memref.load %arg9[%c0_33] : memref<1xf32, #tpu.memory_space<smem>>
    %67 = vector.broadcast %66 : f32 to vector<1x32xf32>
    %68 = arith.addf %65, %67 : vector<1x32xf32>
    %69 = vector.shape_cast %68 : vector<1x32xf32> to vector<1x1x32xf32>
    %c0_34 = arith.constant 0 : index
    %c0_35 = arith.constant 0 : index
    %c0_36 = arith.constant 0 : index
    %70 = vector.load %arg10[%c0_34, %c0_35, %c0_36] : memref<1x1x32xf32, #tpu.memory_space<vmem>>, vector<1x1x32xf32>
    tpu.vector_store %arg10[%c0_34, %c0_35, %c0_36], %69 {strides = array<i32>} : memref<1x1x32xf32, #tpu.memory_space<vmem>>, vector<1x1x32xf32>,
    return
  }
  func.func @transform_0(%arg0: i32) -> (i32, i32, i32) {
    %c0_i32 = arith.constant 0 : i32
    %c0_i32_0 = arith.constant 0 : i32
    %c0_i32_1 = arith.constant 0 : i32
    return %arg0, %c0_i32, %c0_i32_0 : i32, i32, i32
  }
  func.func @transform_1(%arg0: i32) -> (i32, i32, i32) {
    %c0_i32 = arith.constant 0 : i32
    %c0_i32_0 = arith.constant 0 : i32
    %c0_i32_1 = arith.constant 0 : i32
    return %arg0, %c0_i32, %c0_i32_0 : i32, i32, i32
  }
  func.func @transform_2(%arg0: i32) -> (i32, i32, i32) {
    %c0_i32 = arith.constant 0 : i32
    %c0_i32_0 = arith.constant 0 : i32
    %c0_i32_1 = arith.constant 0 : i32
    return %arg0, %c0_i32, %c0_i32_0 : i32, i32, i32
  }
  func.func @transform_3(%arg0: i32) -> (i32, i32, i32) {
    %c0_i32 = arith.constant 0 : i32
    %c0_i32_0 = arith.constant 0 : i32
    %c0_i32_1 = arith.constant 0 : i32
    return %arg0, %c0_i32, %c0_i32_0 : i32, i32, i32
  }
  func.func @transform_4(%arg0: i32) -> (i32, i32) {
    %c0_i32 = arith.constant 0 : i32
    %c0_i32_0 = arith.constant 0 : i32
    %c0_i32_1 = arith.constant 0 : i32
    return %c0_i32, %c0_i32_0 : i32, i32
  }
  func.func @transform_5(%arg0: i32) -> (i32, i32) {
    %c0_i32 = arith.constant 0 : i32
    %c0_i32_0 = arith.constant 0 : i32
    %c0_i32_1 = arith.constant 0 : i32
    return %c0_i32, %c0_i32_0 : i32, i32
  }
  func.func @transform_6(%arg0: i32) -> (i32, i32) {
    %c0_i32 = arith.constant 0 : i32
    %c0_i32_0 = arith.constant 0 : i32
    %c0_i32_1 = arith.constant 0 : i32
    return %c0_i32, %c0_i32_0 : i32, i32
  }
  func.func @transform_7(%arg0: i32) -> (i32, i32) {
    %c0_i32 = arith.constant 0 : i32
    %c0_i32_0 = arith.constant 0 : i32
    %c0_i32_1 = arith.constant 0 : i32
    return %c0_i32, %c0_i32_0 : i32, i32
  }
  func.func @transform_8(%arg0: i32) -> i32 {
    %c0_i32 = arith.constant 0 : i32
    %c0_i32_0 = arith.constant 0 : i32
    return %c0_i32 : i32
  }
  func.func @transform_9(%arg0: i32) -> (i32, i32, i32) {
    %c0_i32 = arith.constant 0 : i32
    %c0_i32_0 = arith.constant 0 : i32
    %c0_i32_1 = arith.constant 0 : i32
    return %arg0, %c0_i32, %c0_i32_0 : i32, i32, i32
  }
}

</mosaic_0001>

<bundles_post_ra>
// kernel: tpu_custom_call.1
= control target key start
LH: loop header
LB: loop body
LE: loop exit
PB: predicated region body
PF: predicated region fallthrough
CT: control target
= control target key end

     0   :  { %s1462_s0 = inlined_call_operand.vmem [shape: bf16[2,32,32], index: 0, kind: input, shape index: {}]   ;;  %s1463_s1 = inlined_call_operand.vmem [shape: bf16[2,1,32], index: 1, kind: input, shape index: {}]   ;;  %s1464_s2 = inlined_call_operand.vmem [shape: f32[2,1,1], index: 2, kind: input, shape index: {}]   ;;  %s1465_s3 = inlined_call_operand.vmem [shape: bf16[2,4,32], index: 3, kind: input, shape index: {}]   ;;  %s1466_s4 = inlined_call_operand.vmem [shape: bf16[96,64], index: 4, kind: input, shape index: {}]   ;;  %s1467_s5 = inlined_call_operand.vmem [shape: f32[1,64], index: 5, kind: input, shape index: {}]   ;;  %s1468_s6 = inlined_call_operand.vmem [shape: bf16[64,32], index: 6, kind: input, shape index: {}]   ;;  %s1469_s7 = inlined_call_operand.vmem [shape: f32[2,32], index: 7, kind: input, shape index: {}]   ;;  %s1470_s8 = inlined_call_operand.<no memory space> [shape: f32[1], index: 8, kind: input, shape index: {}]   ;;  %s1471_s9 = inlined_call_operand.hbm [shape: f32[2,1,32], index: 9, kind: output, shape index: {}]  }
   0x1   :  { %14 = sst [smem:[#allocation2]] %s1470_s8 }
   0x2   :  { %15 = vsyncpa [#allocation4], 0 }
   0x3   :  { %17 = vsyncpa [#allocation4 + $0x1], 0  ;;  %s1277_s11 = smov 0   ;;  %s1279_s12 = smov 0  }
   0x4   :  { %s1281_s13 = smov 0   ;;  %s1283_s14 = smov 0  }
   0x5 LB: > { %s1298_s8 = sadd.s32 4294967295, %s1216_s14   ;;  %s991_s15 = sadd.s32 4294967294, %s1216_s14   ;;  %s1216_s14 = sphi %s1283_s14, %s1477_s14   ;;  %s1212_s13 = sphi %s1281_s13, %s1476_s13   ;;  %s1208_s12 = sphi %s1279_s12, %s1475_s12   ;;  %s1204_s11 = sphi %s1277_s11, %s1474_s11  }
   0x6   : > { %s1302_s16 = sadd.s32 1, %s1216_s14   ;;  %s239_s17 = sadd.s32 1, %s1212_s13 }
   0x7   : > { %s236_s18 = ssub.s32 %s1216_s14, %s1302_s16  ;;  %p249_p0 = scmp.ne.s32.totalorder %s1212_s13, %s1208_s12 }
   0x8   : > { %p237_p1 = scmp.eq.s32.totalorder %s236_s18, 0  ;;  %p250_p2 = scmp.eq.s32.totalorder %s1298_s8, 1 }
   0x9   : > { %p255_p3 = scmp.ne.s32.totalorder %s1208_s12, %s1204_s11  ;;  %p256_p4 = scmp.eq.s32.totalorder %s991_s15, 1 }
   0xa   : > { %s1313_s19 = scalar_select %p237_p1, %s1212_s13, %s239_s17  }
   0xb   : > { %p1315_p5 = por %p250_p2, %p249_p0  ;;  %p1319_p6 = por %p256_p4, %p255_p3 }
   0xc   : > { %p994_p7 = scmp.ge.s32.totalorder %s1216_s14, 1  ;;  %p316_p8 = scmp.lt.s32.totalorder %s1216_s14, 3 }
   0xe   : > { %p317_p9 = pnand %p994_p7, %p316_p8 }
   0xf   : > { %p361_p10 = scmp.lt.s32.totalorder (!%p317_p9), %s1298_s8, 1  ;;  %v1218_v0 = vmov (!%p317_p9), 0.0   ;;  %vm1219_vm0 = vmmov (!%p317_p9), 0   ;;  %v1220_v1 = vmov (!%p317_p9), 0   ;;  %vm394_vm1 = vcmask (!%p317_p9), 261120   ;;  %v1128_v6 = vld [vmem:[%s1466_s4 + $0x10] sm:$0xff] (!%p317_p9)  }
  0x10   : > { %320 = sbr.rel (%p317_p9) target bundleno = 1036 (0x40c), region = 56  ;;  %1041 = vmatprep.subr.bf16.mxu0 (!%p317_p9), %v1218_v0  ;;  %1045 = vmatprep.mubr.msk.bf16.mxu0 (!%p317_p9), %vm1219_vm0, %v1218_v0  ;;  %v1131_v7 = vld [vmem:[%s1466_s4] sm:$0xff] (!%p317_p9)   ;;  %v1129_v8 = vld [vmem:[%s1466_s4 + $0x18] sm:$0xff] (!%p317_p9)   ;;  %v1132_v10 = vld [vmem:[%s1466_s4 + $0x28] sm:$0xff] (!%p317_p9)   ;;  %v444_v11 = vlaneseq (!%p317_p9)  ;;  %s1221_s17 = smov (!%p317_p9), 32   ;;  %vm574_vm2 = vcmask (!%p317_p9), 523264  }
  0x11   : > { %1125 = vset.pattern.permute.xlu0 (!%p317_p9), %v1220_v1  ;;  %1049 = vmatprep.subr.bf16.mxu1 (!%p317_p9), %v1131_v7  ;;  %v1130_v9 = vld [vmem:[%s1466_s4 + $0x20] sm:$0xff] (!%p317_p9)   ;;  %v1133_v15 = vld [vmem:[%s1466_s4 + $0x8] sm:$0xff] (!%p317_p9)   ;;  %v1136_v34 = vld [vmem:[%s1468_s6 + $0x10] sm:$0xff] (!%p317_p9)   ;;  %v1222_v36 = vmov (!%p317_p9), 1966171168   ;;  %s853_s27 = sld [smem:[#allocation2]] (!%p317_p9) }
  0x12   : > { %1050 = vmatpush3.bf16.msra.mxu1 (!%p317_p9), %v1131_v7  ;;  %v1361_v12 = vshrl.u32 (!%p317_p9), %v444_v11, 7  ;;  %v1134_v32 = vld [vmem:[%s1468_s6] sm:$0xff] (!%p317_p9)   ;;  %v1135_v33 = vld [vmem:[%s1468_s6 + $0x8] sm:$0xff] (!%p317_p9)   ;;  %v1137_v35 = vld [vmem:[%s1468_s6 + $0x18] sm:$0xff] (!%p317_p9)   ;;  %v619_v37 = vunpack.c.l.s4 (!%p317_p9), %v1222_v36  ;;  %vm874_vm3 = vcmask (!%p317_p9), 130112   ;;  %vm881_vm4 = vcmask (!%p317_p9), 195712  }
  0x13   : > { %1051 = vmatprep.subr.bf16.mxu1 (!%p317_p9), %v1133_v15  ;;  %v1005_v39 = vld [vmem:[%s1467_s5] ss:$0 sm:$0xff] (!%p317_p9)  ;;  %s1019_s28 = sshll.u32 (!%p317_p9), %s1298_s8, 4  ;;  %vm888_vm5 = vcmask (!%p317_p9), 261312   ;;  %vm891_vm6 = vcmask (!%p317_p9), 253952  }
  0x14   : > { %v1364_v13 = vsub.s32 (!%p317_p9), 0, %v1361_v12  ;;  %v620_v38 = vunpack.c.0.s8 (!%p317_p9), %v619_v37  ;;  %v1011_v36 = vld [vmem:[%s1469_s7] ss:$0 sm:$0xff] (!%p317_p9) }
  0x16   : > { %1052 = vmatpush3.bf16.msra.mxu1 (!%p317_p9), %v1133_v15  ;;  %v623_v40 = vsub.s32 (!%p317_p9), %v620_v38, %v1361_v12 }
  0x17   : > { %s1328_s22 = scalar_select %p361_p10, %s1298_s8, 1  ;;  %1069 = vmatprep.subr.bf16.mxu1 %v1134_v32 }
  0x19   : > { %s1022_s23 = sshll.u32 %s1328_s22, 4  ;;  %s371_s29 = scalar_lea.vmem %s1464_s2, %s1328_s22 }
  0x1a   : > { %s365_s26 = scalar_lea.vmem %s1462_s0, %s1022_s23  ;;  %v438_v4 = vld [vmem:[%s371_s29] sm:$0x1]  ;;  %s368_s15 = scalar_lea.vmem %s1463_s1, %s1328_s22 }
  0x1b   : > { %v1126_v2 = vld [vmem:[%s365_s26] sm:$0xff]   ;;  %v1127_v3 = vld [vmem:[%s365_s26 + $0x8] sm:$0xff]   ;;  %441 = vperm.xlu0 %1125, %v438_v4   ;;  %s997_s18 = sshll.u32 %s1328_s22, 1  ;;  %s359_s22 = sand.u32 1, %s1208_s12  }
  0x1c   : > { %1042 = vmatpush3.bf16.msra.mxu0 %v1126_v2  ;;  %1053 = vmatprep.mubr.msk.bf16.mxu1 %vm394_vm1, %v1126_v2  ;;  %v381_v5 = vld [vmem:[%s368_s15] sm:$0x1]  ;;  %s375_s25 = scalar_lea.vmem %s1465_s3, %s997_s18  ;;  %s360_s29 = scalar_lea.vmem [#allocation3], %s359_s22 }
  0x1d   : > { %1043 = vmatprep.subr.bf16.mxu0 %v1218_v0  ;;  %1054 = vmatmul.mubr.msk.bf16.vlgmr.msra.gmra.mrb[0].mxu1 %vm394_vm1, %v1127_v3  ;;  %v520_v25 = vld [vmem:[%s375_s25] sm:$0x3]  ;;  %s906_s30 = sshll.u32 %s360_s29, 4  ;;  %s894_s8 = scalar_lea.sflag [#allocation4], %s359_s22  ;;  %s1422_s30 = int_to_ptr.vmem [resolvable:$true] %s906_s30 }
  0x1e   : > { %1070 = vmatpush3.bf16.msra.mxu1 %v1134_v32  ;;  %s1154_s18 = scalar_lea.vmem %s1422_s30, 16  ;;  %s1223_s23 = smov [#allocation3]  }
  0x1f   : > { %1071 = vmatprep.subr.bf16.mxu1 %v1135_v33  ;;  %p1155_p11 = scmp.ne.s32.totalorder %s1422_s30, %s1154_s18  ;;  %s1158_s24 = sshll.u32 %s1223_s23, 4  ;;  %s1159_s24 = int_to_ptr.vmem [resolvable:$false] %s1158_s24 }
  0x20   : > { %1044 = vmatpush3.bf16.msra.mxu0 %v1127_v3  ;;  %s1160_s25 = scalar_lea.vmem %s1159_s24, 32  ;;  %p1161_p0 = scmp.lt.s32.totalorder %s1422_s30, %s1159_s24 }
  0x21   : > { %1057 = vmatprep.subr.bf16.mxu0 %v1218_v0  ;;  %p1156_p12 = pnand %p1155_p11, %p1315_p5  ;;  %p1162_p1 = scmp.lt.s32.totalorder %s1160_s25, %s1154_s18 }
  0x22   : > { %1072 = vmatpush3.bf16.msra.mxu1 %v1135_v33 }
  0x23   : > { %1046 = vmatmul.mubr.msk.bf16.vlgmr.msra.gmra.mrb[0].mxu0 %vm394_vm1, %v381_v5  ;;  %1073 = vmatprep.subr.bf16.mxu1 %v1136_v34  ;;  %p1157_p13 = pneg %p1156_p12  ;;  %p1163_p2 = por %p1162_p1, %p1161_p0 }
  0x24   : > { %1065 = vmatprep.mubr.msk.bf16.mxu0 %vm1219_vm0, %v1218_v0  ;;  %1058 = vmatpush3.bf16.msra.mxu0 %v1128_v6 }
  0x25   : > { %1059 = vmatprep.subr.bf16.mxu0 %v1218_v0  ;;  %p1164_p3 = pnand %p1163_p2, %p1157_p13 }
  0x26   : > { %1074 = vmatpush3.bf16.msra.mxu1 %v1136_v34 }
  0x27   : > { %1075 = vmatprep.subr.bf16.mxu1 %v1137_v35 }
  0x28   : > { %1060 = vmatpush3.bf16.msra.mxu0 %v1129_v8 }
  0x29   : > { %1061 = vmatprep.subr.bf16.mxu0 %v1218_v0 }
  0x2a   : > { %1076 = vmatpush3.bf16.msra.mxu1 %v1137_v35 }
  0x2c   : > { %1062 = vmatpush3.bf16.msra.mxu0 %v1130_v9 }
  0x2d   : > { %1063 = vmatprep.subr.bf16.mxu0 %v1218_v0 }
  0x30   : > { %1064 = vmatpush3.bf16.msra.mxu0 %v1132_v10 }
  0x9a   : > { %v442_v14 = vpop.permute.xlu0 %441 }
  0x9b   : > { %v447_v16 = vrot.slane %v442_v14, %v1364_v13 }
  0xf0   : > { %v1055_v28 = vpop.f32.mrb[0].mxu1 }
  0xf1   : > { %v505_v29 = vpop.f32.mrb[1].mxu1 }
  0xf2   : > { %v1056_v30 = vpop.f32.mrb[2].mxu1 }
  0xf3   : > { %v508_v31 = vpop.f32.mrb[3].mxu1 }
  0xf6   : > { %v432_v17 = vpop.f32.mrb[0].mxu0 }
  0xf7   : > { %v448_v18 = vmul.f32 %v447_v16, %v432_v17  ;;  %v1047_v19 = vpop.f32.mrb[1].mxu0 }
  0xf8   : > { %v435_v20 = vpop.f32.mrb[2].mxu0 }
  0xf9   : > { %v521_v21 = vpack.c.bf16 %v448_v18, %v448_v18  ;;  %v1048_v22 = vpop.f32.mrb[3].mxu0 }
  0xfb   : > { %v523_v23 = vpack.i.b16 %v521_v21, %v521_v21 }
  0xfd   : > { %v528_v24 = vrot.slane %v523_v23, %v1364_v13 }
  0xff   : > { %530 = vrot.lane.b32.xlu0 %v528_v24, %s1221_s17  ;;  %s1420_s17 = scalar_lea.hbm %s1471_s9, %s1019_s28 }
 0x171   : > { %v531_v26 = vpop.permute.xlu0 %530 }
 0x172   : > { %v534_v27 = vsel %vm394_vm1, %v520_v25, %v531_v26 }
 0x173   : > { %1066 = vmatmul.mubr.msk.bf16.vlgmr.msra.gmra.mrb[4].mxu0 %vm574_vm2, %v534_v27 }
 0x246   : > { %v611_v41 = vpop.f32.mrb[4].mxu0 }
 0x247   : > { %v612_v42 = vadd.f32 %v1005_v39, %v611_v41  ;;  %v1067_v43 = vpop.f32.mrb[5].mxu0 }
 0x248   : > { %v614_v44 = vpop.f32.mrb[6].mxu0 }
 0x249   : > { %v624_v45 = vrot.slane %v612_v42, %v623_v40  ;;  %v1068_v46 = vpop.f32.mrb[7].mxu0 }
 0x24b   : > { %v625_v47 = vcombine.high %v624_v45, %v624_v45  ;;  %v632_v48 = vrot.slane %v624_v45, %v623_v40 }
 0x24d   : > { %v640_v49 = vcombine.high %v632_v48, %v632_v48  ;;  %v645_v50 = vrot.slane %v632_v48, %v1364_v13  ;;  %v639_v51 = vrot.slane %v625_v47, %v623_v40 }
 0x24f   : > { %v653_v52 = vrot.slane %v640_v49, %v1364_v13  ;;  %v662_v53 = vadd.f32 %v645_v50, %v505_v29  ;;  %v641_v54 = vcombine.high %v639_v51, %v639_v51  ;;  %v649_v55 = vrot.slane %v639_v51, %v1364_v13 }
 0x251   : > { %v664_v56 = vadd.f32 %v1055_v28, %v653_v52  ;;  %v670_v57 = vmul.f32 0.044715, %v662_v53  ;;  %v657_v58 = vrot.slane %v641_v54, %v1364_v13  ;;  %v663_v59 = vadd.f32 %v649_v55, %v508_v31 }
 0x252   : > { %v666_v24 = vmul.f32 0.5, %v662_v53 }
 0x253   : > { %v672_v60 = vmul.f32 0.044715, %v664_v56  ;;  %v674_v61 = vmul.f32 %v670_v57, %v662_v53  ;;  %v665_v62 = vadd.f32 %v1056_v30, %v657_v58  ;;  %v671_v63 = vmul.f32 0.044715, %v663_v59 }
 0x254   : > { %v667_v25 = vmul.f32 0.5, %v663_v59  ;;  %v668_v27 = vmul.f32 0.5, %v664_v56 }
 0x255   : > { %v676_v0 = vmul.f32 %v672_v60, %v664_v56  ;;  %v678_v1 = vmul.f32 %v674_v61, %v662_v53  ;;  %v673_v2 = vmul.f32 0.044715, %v665_v62  ;;  %v675_v3 = vmul.f32 %v671_v63, %v663_v59 }
 0x256   : > { %v669_v28 = vmul.f32 0.5, %v665_v62 }
 0x257   : > { %v680_v4 = vmul.f32 %v676_v0, %v664_v56  ;;  %v682_v5 = vadd.f32 %v678_v1, %v662_v53  ;;  %v677_v6 = vmul.f32 %v673_v2, %v665_v62  ;;  %v679_v7 = vmul.f32 %v675_v3, %v663_v59 }
 0x259   : > { %v684_v8 = vadd.f32 %v680_v4, %v664_v56  ;;  %v686_v9 = vmul.f32 0.7978846, %v682_v5  ;;  %v681_v10 = vmul.f32 %v677_v6, %v665_v62  ;;  %v683_v14 = vadd.f32 %v679_v7, %v663_v59  ;;  %v1018_v6 = vld [vmem:[%s1469_s7 + $0x1] ss:$0 sm:$0xff] }
 0x25b   : > { %v688_v15 = vmul.f32 0.7978846, %v684_v8  ;;  %1138 = vtanh.f32 %v686_v9  ;;  %v685_v13 = vadd.f32 %v681_v10, %v665_v62  ;;  %v687_v16 = vmul.f32 0.7978846, %v683_v14 }
 0x25d   : > { %1140 = vtanh.f32 %v688_v15  ;;  %v689_v17 = vmul.f32 0.7978846, %v685_v13 }
 0x25e   : > { %1142 = vtanh.f32 %v687_v16 }
 0x25f   : > { %1144 = vtanh.f32 %v689_v17 }
 0x265   : > { %v1139_v18 = vpop.eup %1138 }
 0x266   : > { %v694_v20 = vadd.f32 1.0, %v1139_v18 }
 0x267   : > { %v1141_v19 = vpop.eup %1140 }
 0x268   : > { %v1143_v21 = vpop.eup %1142  ;;  %v696_v22 = vadd.f32 1.0, %v1141_v19  ;;  %v698_v30 = vmul.f32 %v694_v20, %v666_v24 }
 0x269   : > { %v1145_v23 = vpop.eup %1144  ;;  %v695_v26 = vadd.f32 1.0, %v1143_v21 }
 0x26a   : > { %v697_v29 = vadd.f32 1.0, %v1145_v23  ;;  %v700_v32 = vmul.f32 %v696_v22, %v668_v27 }
 0x26b   : > { %v699_v31 = vmul.f32 %v695_v26, %v667_v25 }
 0x26c   : > { %v701_v33 = vmul.f32 %v697_v29, %v669_v28  ;;  %v864_v28 = vand.u32 127, %v444_v11 }
 0x26d   : > { %v702_v34 = vpack.c.bf16 %v699_v31, %v698_v30  ;;  %v854_v30 = vstv %s853_s27 }
 0x26e   : > { %v703_v35 = vpack.c.bf16 %v701_v33, %v700_v32  ;;  %v869_v29 = vadd.s32 4294967288, %v864_v28  ;;  %v876_v32 = vadd.s32 4294967280, %v864_v28 }
 0x26f   : > { %1077 = vmatprep.mubr.msk.bf16.mxu1 %vm574_vm2, %v702_v34  ;;  %v867_v34 = vsub.s32 %v864_v28, %v1361_v12 }
 0x270   : > { %1078 = vmatmul.mubr.msk.bf16.vlgmr.msra.gmra.mrb[4].mxu1 %vm574_vm2, %v703_v35 }
 0x343   : > { %v1079_v37 = vpop.f32.mrb[4].mxu1 }
 0x344   : > { %v790_v38 = vadd.f32 %v1079_v37, %v1011_v36  ;;  %v781_v39 = vpop.f32.mrb[5].mxu1  ;;  %v883_v37 = vadd.s32 4294967272, %v864_v28 }
 0x345   : > { %v782_v40 = vadd.f32 %v1011_v36, %v781_v39  ;;  %v1080_v41 = vpop.f32.mrb[6].mxu1 }
 0x346   : > { %v802_v42 = vmul.f32 0.044715, %v790_v38  ;;  %v793_v43 = vadd.f32 %v1080_v41, %v1011_v36  ;;  %v784_v44 = vpop.f32.mrb[7].mxu1  ;;  %v798_v3 = vmul.f32 0.5, %v790_v38 }
 0x347   : > { %v800_v45 = vmul.f32 0.044715, %v782_v40  ;;  %v785_v46 = vadd.f32 %v1011_v36, %v784_v44  ;;  %v796_v7 = vmul.f32 0.5, %v782_v40  ;;  %v872_v36 = vsub.s32 %v869_v29, %v1361_v12 }
 0x348   : > { %v806_v47 = vmul.f32 %v802_v42, %v790_v38  ;;  %v803_v48 = vmul.f32 0.044715, %v793_v43  ;;  %v799_v20 = vmul.f32 0.5, %v793_v43 }
 0x349   : > { %v804_v49 = vmul.f32 %v800_v45, %v782_v40  ;;  %v801_v50 = vmul.f32 0.044715, %v785_v46  ;;  %v797_v15 = vmul.f32 0.5, %v785_v46 }
 0x34a   : > { %v807_v51 = vmul.f32 %v803_v48, %v793_v43  ;;  %v810_v52 = vmul.f32 %v806_v47, %v790_v38 }
 0x34b   : > { %v805_v53 = vmul.f32 %v801_v50, %v785_v46  ;;  %v808_v54 = vmul.f32 %v804_v49, %v782_v40 }
 0x34c   : > { %v814_v55 = vadd.f32 %v810_v52, %v790_v38  ;;  %v811_v56 = vmul.f32 %v807_v51, %v793_v43 }
 0x34d   : > { %v812_v57 = vadd.f32 %v808_v54, %v782_v40  ;;  %v809_v58 = vmul.f32 %v805_v53, %v785_v46  ;;  %v879_v40 = vsub.s32 %v876_v32, %v1361_v12 }
 0x34e   : > { %v818_v59 = vmul.f32 0.7978846, %v814_v55  ;;  %v815_v60 = vadd.f32 %v811_v56, %v793_v43  ;;  %v886_v43 = vsub.s32 %v883_v37, %v1361_v12 }
 0x34f   : > { %v816_v61 = vmul.f32 0.7978846, %v812_v57  ;;  %v813_v62 = vadd.f32 %v809_v58, %v785_v46 }
 0x350   : > { %1146 = vtanh.f32 %v818_v59  ;;  %v819_v63 = vmul.f32 0.7978846, %v815_v60 }
 0x351   : > { %1148 = vtanh.f32 %v816_v61  ;;  %v817_v0 = vmul.f32 0.7978846, %v813_v62 }
 0x352   : > { %1150 = vtanh.f32 %v819_v63 }
 0x353   : > { %1152 = vtanh.f32 %v817_v0 }
 0x35a   : > { %v1147_v1 = vpop.eup %1146 }
 0x35b   : > { %v1149_v2 = vpop.eup %1148  ;;  %v826_v4 = vadd.f32 1.0, %v1147_v1 }
 0x35c   : > { %v1151_v5 = vpop.eup %1150  ;;  %v824_v8 = vadd.f32 1.0, %v1149_v2 }
 0x35d   : > { %v1153_v9 = vpop.eup %1152  ;;  %v830_v10 = vmul.f32 %v826_v4, %v798_v3  ;;  %v827_v16 = vadd.f32 1.0, %v1151_v5 }
 0x35e   : > { %v828_v14 = vmul.f32 %v824_v8, %v796_v7  ;;  %v825_v13 = vadd.f32 1.0, %v1153_v9 }
 0x35f   : > { %v839_v17 = vmul.f32 %v1018_v6, %v830_v10  ;;  %v831_v24 = vmul.f32 %v827_v16, %v799_v20 }
 0x360   : > { %v837_v18 = vmul.f32 %v1018_v6, %v828_v14  ;;  %v829_v19 = vmul.f32 %v825_v13, %v797_v15 }
 0x361   : > { %v847_v21 = vsel %vm394_vm1, %v839_v17, 0.0  ;;  %v840_v26 = vmul.f32 %v1018_v6, %v831_v24 }
 0x362   : > { %848 = vadd.xlane.f32.xlu0 %v847_v21  ;;  %v841_v22 = vsel %vm394_vm1, %v837_v18, 0.0  ;;  %v838_v23 = vmul.f32 %v1018_v6, %v829_v19 }
 0x363   : > { %842 = vadd.xlane.f32.xlu1 %v841_v22  ;;  %v850_v27 = vsel %vm394_vm1, %v840_v26, 0.0 }
 0x364   : > { %v844_v25 = vsel %vm394_vm1, %v838_v23, 0.0 }
 0x367   : > { %845 = vadd.xlane.f32.xlu1 %v844_v25 }
 0x36b   : > { %851 = vadd.xlane.f32.xlu1 %v850_v27 }
 0x3ef   : > { %v849_v33 = vpop.xlane.xlu0 %848 }
 0x3f0   : > { %v843_v31 = vpop.xlane.xlu1 %842  ;;  %v857_v41 = vadd.f32 %v854_v30, %v849_v33 }
 0x3f1   : > { %v855_v35 = vadd.f32 %v854_v30, %v843_v31 }
 0x3f2   : > { %v880_v47 = vrot.slane %v857_v41, %v879_v40 }
 0x3f3   : > { %v868_v11 = vrot.slane %v855_v35, %v867_v34 }
 0x3f4   : > { %v846_v38 = vpop.xlane.xlu1 %845 }
 0x3f5   : > { %v856_v39 = vadd.f32 %v854_v30, %v846_v38 }
 0x3f7   : > { %v873_v42 = vrot.slane %v856_v39, %v872_v36 }
 0x3f8   : > { %v852_v44 = vpop.xlane.xlu1 %851 }
 0x3f9   : > { %v875_v45 = vsel %vm874_vm3, %v873_v42, %v868_v11  ;;  %v858_v46 = vadd.f32 %v854_v30, %v852_v44 }
 0x3fa   : > { %v882_v49 = vsel %vm881_vm4, %v880_v47, %v875_v45 }
 0x3fb   : > { %v887_v48 = vrot.slane %v858_v46, %v886_v43 }
 0x3fd   : > { %v889_v12 = vsel %vm888_vm5, %v887_v48, %v882_v49 }
 0x3fe   : > { %892 = vst.msk [vmem:[%s360_s29] sm:$0x1] %vm891_vm6, %v889_v12 }
 0x3ff   : > { %1167 = shalt.err (!%p1164_p3)
}
 0x400   : > { %s1168_s26 = scalar_lea.hbm %s1420_s17, 16  ;;  %s1172_s28 = scalar_lea.hbm %s1471_s9, 32 }
 0x401   : > { %p1169_p4 = scmp.ne.s32.totalorder %s1420_s17, %s1168_s26  ;;  %p1173_p9 = scmp.lt.u32.totalorder %s1420_s17, %s1471_s9 }
 0x402   : > { %p1174_p10 = scmp.lt.u32.totalorder %s1172_s28, %s1168_s26  ;;  %p1176_p12 = scmp.lt.u32.totalorder %s1168_s26, %s1420_s17 }
 0x403   : > { %p1170_p7 = pnand %p1169_p4, %p1315_p5 }
 0x404   : > { %p1175_p11 = por %p1174_p10, %p1173_p9 }
 0x405   : > { %p1171_p8 = pneg %p1170_p7 }
 0x406   : > { %p1177_p13 = por %p1176_p12, %p1175_p11 }
 0x408   : > { %p1178_p0 = pnand %p1177_p13, %p1171_p8 }
 0x40a   : > { %1181 = shalt.err (!%p1178_p0)
}
 0x40b   : > { %1081 = dma.vmem_to_hbm [thread:$0]  (%p1315_p5), %s1422_s30, 16, %s1420_s17, %s894_s8  }
 0x40c PF: > { %p1087_p1 = scmp.ge.s32.totalorder %s1216_s14, 2  ;;  %s918_s15 = sand.u32 1, %s1204_s11  }
 0x40d   : > { %s919_s18 = scalar_lea.sflag [#allocation4], %s918_s15 }
 0x40e   : > { %p1084_p2 = pnand %p1087_p1, %p1319_p6 }
 0x410   : > { %1199 = dma.done.wait (!%p1084_p2), %s919_s18, 16  }
 0x411   : > { %1201 = vsyncadd (!%p1084_p2), %s919_s18, 4294967280  ;;  %p20_p3 = scmp.ge.s32.totalorder %s1302_s16, 4   ;;  %s1474_s11 = smov %s1208_s12 }
 0x412   : > { %s1475_s12 = smov %s1212_s13  ;;  %s1476_s13 = smov %s1313_s19 }
 0x413   : > { %s1477_s14 = smov %s1302_s16  ;;  %22 = sbr.rel (!%p20_p3) target bundleno = 5 (0x5), region = 100 }
 0x41a   :  { %923 = vsyncpa [#allocation4], 1 }
 0x41b   :  { %925 = vsyncpa [#allocation4 + $0x1], 1 }

</bundles_post_ra>
